<compile_context>
chip_gen: v7x
topology: tpu7x:2x2x1
jax: 0.10.0
libtpu: 0.0.40
codegen_flags: <defaults>
</compile_context>

<pallas_src>
import functools
import math

import jax
import jax.numpy as jnp
from jax import lax
from jax.experimental import pallas as pl
from jax.experimental.pallas import tpu as pltpu

_MASK_NEG = -1e30


def _round_up(n, m):
    return ((n + m - 1) // m) * m


# ---------------------------------------------------------------------------
# Kernels
# ---------------------------------------------------------------------------
def _fused_attention_kernel(x_ref, wkqv_ref, wo_ref, *rest, a_pad, has_mask):
    """Small-S path: one slab of `rows = bt*S` rows per grid step.

    x_ref:    (rows, D_in)
    wkqv_ref: (D_in, 3*a_pad)   [Wk | Wq/sqrt(A) | Wv], zero padded to 128 cols
    wo_ref:   (a_pad, O_pad)
    mask_ref: (rows, rows)      additive block-diagonal mask (only if bt > 1)
    o_ref:    (rows, O_pad)
    """
    if has_mask:
        mask_ref, o_ref = rest
    else:
        (o_ref,) = rest

    x = x_ref[...]  # keep stored dtype (bf16 stays bf16 on the MXU)

    # Fused K/Q/V projection: one wide MXU matmul with f32 accumulation; cast
    # the result back to the input dtype for the attention matmuls.
    kqv = jnp.dot(x, wkqv_ref[...],
                  preferred_element_type=jnp.float32).astype(x.dtype)
    k = kqv[:, 0 * a_pad:1 * a_pad]      # lane-aligned (128-multiple) slices
    q = kqv[:, 1 * a_pad:2 * a_pad]      # pre-scaled by 1/sqrt(A)
    v = kqv[:, 2 * a_pad:3 * a_pad]

    # logits = K @ Q^T: contract the attention dim of both operands; no
    # explicit transpose is materialized.
    logits = lax.dot_general(k, q,
                             dimension_numbers=(((1,), (1,)), ((), ())),
                             preferred_element_type=jnp.float32)  # (rows, rows)
    if has_mask:
        logits = logits + mask_ref[...]  # -1e30 off the block diagonal

    # Row softmax in f32 (matches F.softmax(logits, dim=-1)).
    m = jnp.max(logits, axis=-1, keepdims=True)
    e = jnp.exp(logits - m)
    den = jnp.sum(e, axis=-1, keepdims=True)
    w = (e * pl.reciprocal(den, approx=True)).astype(v.dtype)  # EUP reciprocal

    attn = jnp.dot(w, v, preferred_element_type=jnp.float32)        # (rows, a_pad)
    out = jnp.dot(attn.astype(wo_ref.dtype), wo_ref[...],
                  preferred_element_type=jnp.float32)                # (rows, O_pad)
    o_ref[...] = out.astype(o_ref.dtype)


def _tiled_attention_kernel(x_ref, wkqv_ref, wo_ref, o_ref, kqv_ref, *, a_pad, tq):
    """Large-S path: grid = (batch, query-tile).

    K/Q/V for the whole batch element are computed once (at qi == 0) into a
    VMEM scratch; each step only materializes a (tq, S) logits tile.
    """
    qi = pl.program_id(1)

    @pl.when(qi == 0)
    def _():
        kqv = jnp.dot(x_ref[...], wkqv_ref[...],
                      preferred_element_type=jnp.float32)
        kqv_ref[...] = kqv.astype(kqv_ref.dtype)

    row0 = pl.multiple_of(qi * tq, tq)
    k_rows = kqv_ref[pl.ds(row0, tq), pl.ds(0, a_pad)]          # (tq, a_pad)
    q_all = kqv_ref[:, pl.ds(1 * a_pad, a_pad)]                 # (S, a_pad)
    v_all = kqv_ref[:, pl.ds(2 * a_pad, a_pad)]                 # (S, a_pad)

    logits = lax.dot_general(k_rows, q_all,
                             dimension_numbers=(((1,), (1,)), ((), ())),
                             preferred_element_type=jnp.float32)  # (tq, S)
    m = jnp.max(logits, axis=-1, keepdims=True)
    e = jnp.exp(logits - m)
    den = jnp.sum(e, axis=-1, keepdims=True)
    w = (e * pl.reciprocal(den, approx=True)).astype(v_all.dtype)

    attn = jnp.dot(w, v_all, preferred_element_type=jnp.float32)     # (tq, a_pad)
    out = jnp.dot(attn.astype(wo_ref.dtype), wo_ref[...],
                  preferred_element_type=jnp.float32)                 # (tq, O_pad)
    o_ref[...] = out.astype(o_ref.dtype)


# ---------------------------------------------------------------------------
# Tiling / generation heuristics
# ---------------------------------------------------------------------------
def _chip_profile():
    """Per-generation VMEM budget / core count (conservative if unknown)."""
    kind = ""
    try:
        kind = jax.devices()[0].device_kind.lower()
    except Exception:
        pass
    if "v7" in kind or "tpu7" in kind:
        # 2 TensorCores / chip, 64 MiB VMEM per core.
        return {"cores": 2, "budget": 36 << 20, "vmem_limit": 48 << 20}
    if "v6" in kind or "v5" in kind:
        cores = 2 if "v5p" in kind else 1   # v5e/v6e are single-TC
        return {"cores": cores, "budget": 60 << 20, "vmem_limit": 80 << 20}
    # Unknown / older chip: stay within the default scoped VMEM limit.
    return {"cores": 1, "budget": 12 << 20, "vmem_limit": None}


def _weight_spec(shape, index_map):
    """Constant-index resident block: single-buffered when supported."""
    try:
        return pl.BlockSpec(shape, index_map, pipeline_mode=pl.Buffered(1))
    except Exception:  # older jax without pipeline_mode / Buffered
        return pl.BlockSpec(shape, index_map)


def _compiler_params(sem, vmem_limit):
    kwargs = {"dimension_semantics": sem}
    if vmem_limit is not None:
        kwargs["vmem_limit_bytes"] = int(vmem_limit)
    return pltpu.CompilerParams(**kwargs)


def _pick_bt_fused(B, S, D_in, a_pad, o_pad, esz, budget, cores):
    """How many batch elements to pack into one fused row slab."""
    def rows_aligned(d):
        return (d * S) % 8 == 0 or d == B

    cands = [d for d in range(B, 0, -1) if B % d == 0 and rows_aligned(d)]

    def est(d):
        rows = d * S
        x_blk = 2 * rows * D_in * esz            # double-buffered input block
        o_blk = 2 * rows * o_pad * esz           # double-buffered output block
        w_res = (D_in * 3 * a_pad + a_pad * o_pad) * esz  # Buffered(1) weights
        mask = rows * rows * 4 if d > 1 else 0
        tmp = (rows * 3 * a_pad * (4 + esz)      # f32 kqv + cast copy
               + 3 * rows * rows * 4             # logits / e / w
               + rows * (a_pad + o_pad) * 4)     # attn + out f32
        return x_blk + o_blk + w_res + mask + tmp + (1 << 20)

    def ok(d):
        return d * S <= 512 and est(d) <= budget

    order = cands
    if cores >= 2 and B >= 2:
        # Prefer >=2 grid steps only on multi-TensorCore parts (v7x).
        multi = [d for d in cands if B // d >= 2]
        rest = [d for d in cands if B // d < 2]
        order = (multi + rest) if multi else cands

    for d in order:
        if ok(d):
            return d
    return cands[-1]


def _pick_tq_tiled(S, D_in, a_pad, o_pad, esz, budget):
    """Query-row tile for the large-S path."""
    start = min(S, 512)
    start -= start % 8
    cands = [t for t in range(start, 7, -8) if S % t == 0]
    if not cands:
        cands = [S]

    def est(t):
        x_blk = 2 * S * D_in * esz
        o_blk = 2 * t * o_pad * esz
        w_res = (D_in * 3 * a_pad + a_pad * o_pad) * esz
        scr = S * 3 * a_pad * esz
        tmp = max(S * 3 * a_pad * 4,
                  3 * t * S * 4 + t * (a_pad + o_pad) * 4)
        return x_blk + o_blk + w_res + scr + tmp + (1 << 20)

    for t in cands:
        if est(t) <= budget:
            return t
    return cands[-1]


# ---------------------------------------------------------------------------
# Wrapper
# ---------------------------------------------------------------------------
def self_attention(x, wk, wq, wv, wo, attention_size, *, batch_tile=None, q_tile=None):
    """x: (B, S, D_in); wk/wq/wv: (D_in, A); wo: (A, O) -> (B, S, O)."""
    B, S, D_in = x.shape
    A = wk.shape[1]
    O = wo.shape[1]
    dt = x.dtype
    esz = jnp.dtype(dt).itemsize

    a_pad = _round_up(A, 128)
    o_pad = _round_up(O, 128)

    # Fold 1/sqrt(A) into Wq; pad each projection to a 128-column multiple so
    # the in-kernel K/Q/V slices are lane-aligned; fuse into one weight.
    scale = 1.0 / math.sqrt(attention_size)

    def pad_cols(w, n):
        return jnp.pad(w, ((0, 0), (0, n - w.shape[1])))

    w_kqv = jnp.concatenate(
        [pad_cols(wk, a_pad), pad_cols(wq * scale, a_pad), pad_cols(wv, a_pad)],
        axis=1).astype(dt)                                       # (D_in, 3*a_pad)
    wo_p = jnp.pad(wo, ((0, a_pad - A), (0, o_pad - O))).astype(dt)  # (a_pad, o_pad)

    prof = _chip_profile()
    budget, cores, vmem_limit = prof["budget"], prof["cores"], prof["vmem_limit"]

    x2 = x.reshape(B * S, D_in)

    use_fused = (S <= 512) or (S % 8 != 0)

    if use_fused:
        # ----- small-S path: pack bt batch elements into one row slab -------
        if batch_tile is not None:
            bt = int(batch_tile)
            if B % bt != 0 or ((bt * S) % 8 != 0 and bt != B):
                raise ValueError(f"invalid batch_tile={bt} for B={B}, S={S}")
        else:
            bt = _pick_bt_fused(B, S, D_in, a_pad, o_pad, esz, budget, cores)
        rows = bt * S
        steps = B // bt
        has_mask = bt > 1

        kernel = functools.partial(_fused_attention_kernel,
                                   a_pad=a_pad, has_mask=has_mask)

        in_specs = [
            pl.BlockSpec((rows, D_in), lambda i: (i, 0)),
            _weight_spec((D_in, 3 * a_pad), lambda i: (0, 0)),
            _weight_spec((a_pad, o_pad), lambda i: (0, 0)),
        ]
        args = [x2, w_kqv, wo_p]
        if has_mask:
            # Additive block-diagonal mask: 0 within a batch element, -1e30
            # across batch elements (exp underflows to exactly 0).
            ids = jnp.arange(rows, dtype=jnp.int32) // S
            neg_mask = jnp.where(ids[:, None] == ids[None, :],
                                 jnp.float32(0.0), jnp.float32(_MASK_NEG))
            in_specs.append(_weight_spec((rows, rows), lambda i: (0, 0)))
            args.append(neg_mask)

        out2 = pl.pallas_call(
            kernel,
            out_shape=jax.ShapeDtypeStruct((B * S, o_pad), dt),
            grid_spec=pltpu.PrefetchScalarGridSpec(
                num_scalar_prefetch=0,
                grid=(steps,),
                in_specs=in_specs,
                out_specs=pl.BlockSpec((rows, o_pad), lambda i: (i, 0)),
            ),
            compiler_params=_compiler_params(("parallel",), vmem_limit),
        )(*args)
    else:
        # ----- large-S path: one batch element per step, query-tiled rows ---
        if q_tile is not None:
            tq = int(q_tile)
            if S % tq != 0 or (tq % 8 != 0 and tq != S):
                raise ValueError(f"invalid q_tile={tq} for S={S}")
        else:
            tq = _pick_tq_tiled(S, D_in, a_pad, o_pad, esz, budget)
        nq = S // tq

        kernel = functools.partial(_tiled_attention_kernel, a_pad=a_pad, tq=tq)

        out2 = pl.pallas_call(
            kernel,
            out_shape=jax.ShapeDtypeStruct((B * S, o_pad), dt),
            grid_spec=pltpu.PrefetchScalarGridSpec(
                num_scalar_prefetch=0,
                grid=(B, nq),
                in_specs=[
                    pl.BlockSpec((S, D_in), lambda b, q: (b, 0)),
                    _weight_spec((D_in, 3 * a_pad), lambda b, q: (0, 0)),
                    _weight_spec((a_pad, o_pad), lambda b, q: (0, 0)),
                ],
                out_specs=pl.BlockSpec((tq, o_pad), lambda b, q: (b * nq + q, 0)),
                scratch_shapes=[pltpu.VMEM((S, 3 * a_pad), dt)],
            ),
            compiler_params=_compiler_params(("parallel", "arbitrary"), vmem_limit),
        )(x2, w_kqv, wo_p)

    # Strip the output padding and restore (B, S, O).
    return out2[:, :O].reshape(B, S, O)


def _reference(x, wk, wq, wv, wo, attention_size):
    # Pure-JAX re-implementation of the PyTorch forward (for verification).
    K = x @ wk
    Q = jnp.swapaxes(x @ wq, -1, -2)
    V = jnp.swapaxes(x @ wv, -1, -2)
    logits = (K @ Q) / jnp.sqrt(jnp.float32(attention_size))
    weight = jax.nn.softmax(logits, axis=-1)
    weight = jnp.swapaxes(weight, -1, -2)
    mid = V @ weight
    attention = jnp.swapaxes(mid, -1, -2)
    return attention @ wo


if __name__ == "__main__":
    def init_w(k, fan_in, fan_out):
        bound = 1.0 / math.sqrt(fan_in)
        return jax.random.uniform(k, (fan_in, fan_out), jnp.float32, -bound, bound)

    # ---- Test 1: small shapes consistent with the module (fused path). ----
    B, S = 2, 8
    input_size, attention_size, output_size = 32, 32, 32

    key = jax.random.PRNGKey(0)
    kx, kk, kq, kv, ko = jax.random.split(key, 5)
    x = jax.random.normal(kx, (B, S, input_size), dtype=jnp.float32)
    wk = init_w(kk, input_size, attention_size)
    wq = init_w(kq, input_size, attention_size)
    wv = init_w(kv, input_size, attention_size)
    wo = init_w(ko, attention_size, output_size)

    out = jax.block_until_ready(self_attention(x, wk, wq, wv, wo, attention_size))
    ref = _reference(x, wk, wq, wv, wo, attention_size)
    assert out.shape == (B, S, output_size)
    err = float(jnp.max(jnp.abs(out - ref)))
    # Slightly loose tolerance: softmax normalization uses the approximate
    # (EUP) reciprocal.
    assert jnp.allclose(out, ref, atol=5e-3, rtol=5e-3), f"fused path mismatch: {err}"

    # ---- Test 2: larger sequence to exercise the query-tiled path. --------
    B2, S2, D2, A2, O2 = 2, 1024, 64, 64, 48
    key2 = jax.random.PRNGKey(0)
    kx2, kk2, kq2, kv2, ko2 = jax.random.split(key2, 5)
    x_big = jax.random.normal(kx2, (B2, S2, D2), dtype=jnp.float32)
    wk2 = init_w(kk2, D2, A2)
    wq2 = init_w(kq2, D2, A2)
    wv2 = init_w(kv2, D2, A2)
    wo2 = init_w(ko2, A2, O2)

    out2 = jax.block_until_ready(self_attention(x_big, wk2, wq2, wv2, wo2, A2))
    ref2 = _reference(x_big, wk2, wq2, wv2, wo2, A2)
    assert out2.shape == (B2, S2, O2)
    err2 = float(jnp.max(jnp.abs(out2 - ref2)))
    assert jnp.allclose(out2, ref2, atol=5e-3, rtol=5e-3), f"tiled path mismatch: {err2}"

    print("KERNEL_OK")
</pallas_src>

<mosaic_0001>
module attributes {stable_mosaic.version = 11 : i64} {
  func.func @_fused_attention_kernel(%arg0: i32, %arg1: memref<16x32xf32, #tpu.memory_space<vmem>>, %arg2: memref<32x384xf32, #tpu.memory_space<vmem>>, %arg3: memref<128x128xf32, #tpu.memory_space<vmem>>, %arg4: memref<16x16xf32, #tpu.memory_space<vmem>>, %arg5: memref<16x128xf32, #tpu.memory_space<vmem>>) attributes {dimension_semantics = [#tpu.dimension_semantics<parallel>], iteration_bounds = array<i64: 1>, scalar_prefetch = 0 : i64, scratch_operands = 0 : i64, tpu.core_type = #tpu.core_type<tc>, window_params = [{transform_indices = @transform_0, window_bounds = array<i64: 16, 32>}, {pipeline_mode = #tpu.pipeline_mode<synchronous>, transform_indices = @transform_1, window_bounds = array<i64: 32, 384>}, {pipeline_mode = #tpu.pipeline_mode<synchronous>, transform_indices = @transform_2, window_bounds = array<i64: 128, 128>}, {pipeline_mode = #tpu.pipeline_mode<synchronous>, transform_indices = @transform_3, window_bounds = array<i64: 16, 16>}, {transform_indices = @transform_4, window_bounds = array<i64: 16, 128>}]} {
    %c0 = arith.constant 0 : index
    %c0_0 = arith.constant 0 : index
    %0 = vector.load %arg1[%c0, %c0_0] : memref<16x32xf32, #tpu.memory_space<vmem>>, vector<16x32xf32>
    %c0_1 = arith.constant 0 : index
    %c0_2 = arith.constant 0 : index
    %1 = vector.load %arg2[%c0_1, %c0_2] : memref<32x384xf32, #tpu.memory_space<vmem>>, vector<32x384xf32>
    %cst = arith.constant dense<0.000000e+00> : vector<16x384xf32>
    %2 = tpu.matmul %0, %1, %cst {dimension_numbers = #tpu.dot_dimension_numbers<[1], [0], [0], [1], [0, 0, 1, 1], [], []>} : vector<16x32xf32>, vector<32x384xf32>, vector<16x384xf32> -> vector<16x384xf32>
    %3 = vector.extract_strided_slice %2 {offsets = [0, 0], sizes = [16, 128], strides = [1, 1]} : vector<16x384xf32> to vector<16x128xf32>
    %4 = vector.extract_strided_slice %2 {offsets = [0, 128], sizes = [16, 128], strides = [1, 1]} : vector<16x384xf32> to vector<16x128xf32>
    %5 = vector.extract_strided_slice %2 {offsets = [0, 256], sizes = [16, 128], strides = [1, 1]} : vector<16x384xf32> to vector<16x128xf32>
    %cst_3 = arith.constant dense<0.000000e+00> : vector<16x16xf32>
    %6 = tpu.matmul %3, %4, %cst_3 {dimension_numbers = #tpu.dot_dimension_numbers<[1], [1], [0], [0], [0, 0, 1, 0], [], []>} : vector<16x128xf32>, vector<16x128xf32>, vector<16x16xf32> -> vector<16x16xf32>
    %c0_4 = arith.constant 0 : index
    %c0_5 = arith.constant 0 : index
    %7 = vector.load %arg4[%c0_4, %c0_5] : memref<16x16xf32, #tpu.memory_space<vmem>>, vector<16x16xf32>
    %8 = arith.addf %6, %7 : vector<16x16xf32>
    %cst_6 = arith.constant dense<0xFF800000> : vector<16xf32>
    %9 = vector.multi_reduction <maximumf>, %8, %cst_6 [1] : vector<16x16xf32> to vector<16xf32>
    %10 = vector.shape_cast %9 : vector<16xf32> to vector<16x1xf32>
    %11 = vector.broadcast %10 : vector<16x1xf32> to vector<16x16xf32>
    %12 = arith.subf %8, %11 : vector<16x16xf32>
    %13 = math.exp %12 : vector<16x16xf32>
    %cst_7 = arith.constant dense<0.000000e+00> : vector<16xf32>
    %14 = vector.multi_reduction <add>, %13, %cst_7 [1] : vector<16x16xf32> to vector<16xf32>
    %15 = vector.shape_cast %14 : vector<16xf32> to vector<16x1xf32>
    %16 = tpu.reciprocal %15 {approx = true} : vector<16x1xf32> -> vector<16x1xf32>
    %17 = vector.broadcast %16 : vector<16x1xf32> to vector<16x16xf32>
    %18 = arith.mulf %13, %17 : vector<16x16xf32>
    %cst_8 = arith.constant dense<0.000000e+00> : vector<16x128xf32>
    %19 = tpu.matmul %18, %5, %cst_8 {dimension_numbers = #tpu.dot_dimension_numbers<[1], [0], [0], [1], [0, 0, 1, 1], [], []>} : vector<16x16xf32>, vector<16x128xf32>, vector<16x128xf32> -> vector<16x128xf32>
    %c0_9 = arith.constant 0 : index
    %c0_10 = arith.constant 0 : index
    %20 = vector.load %arg3[%c0_9, %c0_10] : memref<128x128xf32, #tpu.memory_space<vmem>>, vector<128x128xf32>
    %cst_11 = arith.constant dense<0.000000e+00> : vector<16x128xf32>
    %21 = tpu.matmul %19, %20, %cst_11 {dimension_numbers = #tpu.dot_dimension_numbers<[1], [0], [0], [1], [0, 0, 1, 1], [], []>} : vector<16x128xf32>, vector<128x128xf32>, vector<16x128xf32> -> vector<16x128xf32>
    %c0_12 = arith.constant 0 : index
    %c0_13 = arith.constant 0 : index
    %22 = vector.load %arg5[%c0_12, %c0_13] : memref<16x128xf32, #tpu.memory_space<vmem>>, vector<16x128xf32>
    tpu.vector_store %arg5[%c0_12, %c0_13], %21 {strides = array<i32>} : memref<16x128xf32, #tpu.memory_space<vmem>>, vector<16x128xf32>,
    return
  }
  func.func @transform_0(%arg0: i32) -> (i32, i32) {
    %c0_i32 = arith.constant 0 : i32
    %c0_i32_0 = arith.constant 0 : i32
    return %arg0, %c0_i32 : i32, i32
  }
  func.func @transform_1(%arg0: i32) -> (i32, i32) {
    %c0_i32 = arith.constant 0 : i32
    %c0_i32_0 = arith.constant 0 : i32
    %c0_i32_1 = arith.constant 0 : i32
    return %c0_i32, %c0_i32_0 : i32, i32
  }
  func.func @transform_2(%arg0: i32) -> (i32, i32) {
    %c0_i32 = arith.constant 0 : i32
    %c0_i32_0 = arith.constant 0 : i32
    %c0_i32_1 = arith.constant 0 : i32
    return %c0_i32, %c0_i32_0 : i32, i32
  }
  func.func @transform_3(%arg0: i32) -> (i32, i32) {
    %c0_i32 = arith.constant 0 : i32
    %c0_i32_0 = arith.constant 0 : i32
    %c0_i32_1 = arith.constant 0 : i32
    return %c0_i32, %c0_i32_0 : i32, i32
  }
  func.func @transform_4(%arg0: i32) -> (i32, i32) {
    %c0_i32 = arith.constant 0 : i32
    %c0_i32_0 = arith.constant 0 : i32
    return %arg0, %c0_i32 : i32, i32
  }
}

</mosaic_0001>

<bundles_post_ra>
// kernel: tpu_custom_call.1
= control target key start
LH: loop header
LB: loop body
LE: loop exit
PB: predicated region body
PF: predicated region fallthrough
CT: control target
= control target key end

     0   :  { %9 = vsyncpa [#allocation3], 0  ;;  %s949_s0 = inlined_call_operand.hbm [shape: f32[16,32], index: 0, kind: input, shape index: {}]   ;;  %s950_s1 = inlined_call_operand.hbm [shape: f32[32,384], index: 1, kind: input, shape index: {}]   ;;  %s951_s2 = inlined_call_operand.hbm [shape: f32[128,128], index: 2, kind: input, shape index: {}]   ;;  %s952_s3 = inlined_call_operand.hbm [shape: f32[16,16], index: 3, kind: input, shape index: {}]   ;;  %s953_s4 = inlined_call_operand.hbm [shape: f32[16,128], index: 4, kind: output, shape index: {}]  }
   0x1   :  { %10 = vsyncpa [#allocation6], 0 }
   0x2   :  { %11 = vsyncpa [#allocation9], 0 }
   0x3   :  { %12 = vsyncpa [#allocation4], 0  ;;  %s829_s15 = smov [#allocation5]   ;;  %s711_s19 = scalar_lea.hbm %s950_s1, 1536 }
   0x4   :  { %s30_s16 = sshll.u32 %s829_s15, 4  ;;  %p712_p0 = scmp.ne.s32.totalorder %s950_s1, %s711_s19  ;;  %s31_s16 = int_to_ptr.vmem [resolvable:$true] %s30_s16 }
   0x5   :  { %p715_p1 = scmp.lt.u32.totalorder %s711_s19, %s950_s1 }
   0x7   :  { %p717_p2 = pnand %p715_p1, %p712_p0 }
   0x9   :  { %720 = shalt.err (!%p717_p2)
}
   0xa   :  { %s721_s24 = scalar_lea.vmem %s31_s16, 1536  ;;  %p726_p4 = scmp.lt.s32.totalorder %s31_s16, %s31_s16 }
   0xb   :  { %p722_p3 = scmp.ne.s32.totalorder %s31_s16, %s721_s24  ;;  %p727_p5 = scmp.lt.s32.totalorder %s721_s24, %s721_s24 }
   0xd   :  { %p728_p6 = por %p727_p5, %p726_p4 }
   0xf   :  { %p729_p7 = pnand %p728_p6, %p722_p3 }
  0x11   :  { %732 = shalt.err (!%p729_p7)
}
  0x12   :  { %s830_s25 = smov 384   ;;  %s831_s26 = smov 24  }
  0x13   :  { %36 = dma.hbm_to_vmem [thread:$0]  %s950_s1, 1536, %s31_s16, [#allocation6], %s830_s25, %s830_s25, %s831_s26  }
  0x14   :  { %s832_s29 = smov [#allocation2]   ;;  %s733_s7 = scalar_lea.hbm %s949_s0, 256 }
  0x15   :  { %s18_s30 = sshll.u32 %s832_s29, 4  ;;  %p734_p8 = scmp.ne.s32.totalorder %s949_s0, %s733_s7  ;;  %s19_s30 = int_to_ptr.vmem [resolvable:$true] %s18_s30 }
  0x16   :  { %p737_p9 = scmp.lt.u32.totalorder %s733_s7, %s949_s0 }
  0x18   :  { %p739_p10 = pnand %p737_p9, %p734_p8 }
  0x1a   :  { %742 = shalt.err (!%p739_p10)
}
  0x1b   :  { %s743_s12 = scalar_lea.vmem %s19_s30, 256  ;;  %p748_p12 = scmp.lt.s32.totalorder %s19_s30, %s19_s30 }
  0x1c   :  { %p744_p11 = scmp.ne.s32.totalorder %s19_s30, %s743_s12  ;;  %p749_p13 = scmp.lt.s32.totalorder %s743_s12, %s743_s12 }
  0x1e   :  { %p750_p0 = por %p749_p13, %p748_p12 }
  0x20   :  { %p751_p1 = pnand %p750_p0, %p744_p11 }
  0x22   :  { %754 = shalt.err (!%p751_p1)
}
  0x23   :  { %s833_s1 = smov 128   ;;  %s834_s13 = smov 8  }
  0x24   :  { %24 = dma.hbm_to_vmem [thread:$0]  %s949_s0, 256, %s19_s30, [#allocation3], %s833_s1, %s833_s1, %s834_s13  }
  0x25   :  { %s835_s16 = smov [#allocation7]   ;;  %s836_s18 = smov [#allocation8]  }
  0x26   :  { %s42_s17 = sshll.u32 %s835_s16, 4  ;;  %s54_s19 = sshll.u32 %s836_s18, 4  ;;  %s43_s17 = int_to_ptr.vmem [resolvable:$true] %s42_s17  ;;  %s891_s19 = int_to_ptr.vmem [resolvable:$true] %s54_s19 }
  0x27   :  { %s755_s22 = scalar_lea.hbm %s951_s2, 2048 }
  0x28   :  { %p756_p2 = scmp.ne.s32.totalorder %s951_s2, %s755_s22  ;;  %p759_p3 = scmp.lt.u32.totalorder %s755_s22, %s951_s2 }
  0x2a   :  { %p761_p4 = pnand %p759_p3, %p756_p2 }
  0x2c   :  { %764 = shalt.err (!%p761_p4)
}
  0x2d   :  { %s765_s0 = scalar_lea.vmem %s43_s17, 2048  ;;  %p770_p6 = scmp.lt.s32.totalorder %s43_s17, %s43_s17 }
  0x2e   :  { %p766_p5 = scmp.ne.s32.totalorder %s43_s17, %s765_s0  ;;  %p771_p7 = scmp.lt.s32.totalorder %s765_s0, %s765_s0 }
  0x30   :  { %p772_p8 = por %p771_p7, %p770_p6 }
  0x32   :  { %p773_p9 = pnand %p772_p8, %p766_p5 }
  0x34   :  { %776 = shalt.err (!%p773_p9)
}
  0x35   :  { %48 = dma.hbm_to_vmem [thread:$0]  %s951_s2, 2048, %s43_s17, [#allocation6], %s833_s1, %s833_s1, %s834_s13  }
  0x36   :  { %s777_s5 = scalar_lea.hbm %s952_s3, 256 }
  0x37   :  { %p778_p10 = scmp.ne.s32.totalorder %s952_s3, %s777_s5  ;;  %p781_p11 = scmp.lt.u32.totalorder %s777_s5, %s952_s3 }
  0x39   :  { %p783_p12 = pnand %p781_p11, %p778_p10 }
  0x3b   :  { %786 = shalt.err (!%p783_p12)
}
  0x3c   :  { %s787_s10 = scalar_lea.vmem %s891_s19, 256  ;;  %p792_p0 = scmp.lt.s32.totalorder %s891_s19, %s891_s19 }
  0x3d   :  { %p788_p13 = scmp.ne.s32.totalorder %s891_s19, %s787_s10  ;;  %p793_p1 = scmp.lt.s32.totalorder %s787_s10, %s787_s10 }
  0x3f   :  { %p794_p2 = por %p793_p1, %p792_p0 }
  0x41   :  { %p795_p3 = pnand %p794_p2, %p788_p13 }
  0x43   :  { %798 = shalt.err (!%p795_p3)
}
  0x44   :  { %60 = dma.hbm_to_vmem [thread:$0]  %s952_s3, 256, %s891_s19, [#allocation9], %s833_s1, %s833_s1, %s834_s13  }
  0x45   :  { %821 = dma.done.wait [#allocation3], 256  }
  0x46   :  { %822 = vsyncadd [#allocation3], 4294967040 }
  0x47   :  { %823 = dma.done.wait [#allocation6], 3584  }
  0x48   :  { %824 = vsyncadd [#allocation6], 4294963712 }
  0x49   :  { %825 = dma.done.wait [#allocation9], 256  }
  0x4a   :  { %826 = vsyncadd [#allocation9], 4294967040  ;;  %v837_v0 = vmov 0.0   ;;  %v76_v1 = vld [vmem:[#allocation5 + $0x8] sm:$0xff]  ;;  %v79_v2 = vld [vmem:[#allocation5 + $0x20] sm:$0xff]  ;;  %vm87_vm0 = vcmask 261120  }
  0x4b   :  { %158 = vmatprep.mubr.f32.mxu0 %v837_v0  ;;  %v75_v3 = vld [vmem:[#allocation5] sm:$0xff]  ;;  %v637_v4 = vpack.c.bf16 %v79_v2, %v76_v1  ;;  %v78_v5 = vld [vmem:[#allocation5 + $0x18] sm:$0xff]  ;;  %v85_v7 = vld [vmem:[#allocation5 + $0x50] sm:$0xff]  ;;  %vm323_vm1 = vcmask 130048   ;;  %s838_s3 = smov [#allocation10]  }
  0x4c   :  { %v82_v6 = vld [vmem:[#allocation5 + $0x38] sm:$0xff]  ;;  %v639_v8 = vpack.c.bf16 %v78_v5, %v75_v3  ;;  %v81_v10 = vld [vmem:[#allocation5 + $0x30] sm:$0xff]  ;;  %v84_v11 = vld [vmem:[#allocation5 + $0x48] sm:$0xff]  ;;  %s525_s12 = sshll.u32 %s838_s3, 4  ;;  %s526_s12 = int_to_ptr.vmem [resolvable:$true] %s525_s12 }
  0x4d   :  { %v641_v9 = vpack.c.bf16 %v85_v7, %v82_v6  ;;  %638 = vmatprep.subr.bf16.mxu0 %v637_v4  ;;  %v77_v12 = vld [vmem:[#allocation5 + $0x10] sm:$0xff]  ;;  %v80_v13 = vld [vmem:[#allocation5 + $0x28] sm:$0xff]  ;;  %v643_v14 = vpack.c.bf16 %v84_v11, %v81_v10  ;;  %v83_v16 = vld [vmem:[#allocation5 + $0x40] sm:$0xff]  ;;  %s799_s14 = scalar_lea.vmem %s526_s12, 256  ;;  %p804_p5 = scmp.lt.s32.totalorder %s526_s12, %s526_s12 }
  0x4e   :  { %640 = vmatpush1.bf16.msra.mxu0 %v639_v8  ;;  %v645_v15 = vpack.c.bf16 %v80_v13, %v77_v12  ;;  %v86_v17 = vld [vmem:[#allocation5 + $0x58] sm:$0xff]  ;;  %v73_v18 = vld [vmem:[#allocation2] sm:$0xff]  ;;  %v246_v29 = vld [vmem:[#allocation8] sm:$0xff]  ;;  %p800_p4 = scmp.ne.s32.totalorder %s526_s12, %s799_s14  ;;  %p805_p6 = scmp.lt.s32.totalorder %s799_s14, %s799_s14 }
  0x4f   :  { %642 = vmatprep.subr.bf16.mxu0 %v641_v9  ;;  %v649_v19 = vpack.c.bf16 %v86_v17, %v83_v16  ;;  %v74_v20 = vld [vmem:[#allocation2 + $0x8] sm:$0xff]  ;;  %v247_v31 = vld [vmem:[#allocation8 + $0x8] sm:$0xff]  ;;  %v427_v47 = vld [vmem:[#allocation7] sm:$0xff] }
  0x50   :  { %v428_v48 = vld [vmem:[#allocation7 + $0x8] sm:$0xff]  ;;  %v429_v49 = vld [vmem:[#allocation7 + $0x10] sm:$0xff]  ;;  %v430_v51 = vld [vmem:[#allocation7 + $0x18] sm:$0xff]  ;;  %p806_p7 = por %p805_p6, %p804_p5 }
  0x51   :  { %v661_v50 = vpack.c.bf16 %v428_v48, %v427_v47  ;;  %v665_v52 = vpack.c.bf16 %v430_v51, %v429_v49  ;;  %v431_v53 = vld [vmem:[#allocation7 + $0x20] sm:$0xff]  ;;  %v432_v54 = vld [vmem:[#allocation7 + $0x28] sm:$0xff]  ;;  %v433_v56 = vld [vmem:[#allocation7 + $0x30] sm:$0xff] }
  0x52   :  { %644 = vmatpush1.bf16.msra.mxu0 %v643_v14  ;;  %v669_v55 = vpack.c.bf16 %v432_v54, %v431_v53  ;;  %v434_v57 = vld [vmem:[#allocation7 + $0x38] sm:$0xff]  ;;  %v435_v59 = vld [vmem:[#allocation7 + $0x40] sm:$0xff]  ;;  %v436_v60 = vld [vmem:[#allocation7 + $0x48] sm:$0xff]  ;;  %p807_p8 = pnand %p806_p7, %p800_p4 }
  0x53   :  { %646 = vmatprep.subr.bf16.mxu0 %v645_v15  ;;  %662 = vmatprep.subr.bf16.mxu1 %v661_v50  ;;  %v673_v58 = vpack.c.bf16 %v434_v57, %v433_v56  ;;  %v677_v61 = vpack.c.bf16 %v436_v60, %v435_v59  ;;  %v437_v62 = vld [vmem:[#allocation7 + $0x50] sm:$0xff]  ;;  %v438_v63 = vld [vmem:[#allocation7 + $0x58] sm:$0xff]  ;;  %v439_v1 = vld [vmem:[#allocation7 + $0x60] sm:$0xff] }
  0x54   :  { %664 = vmatpush3.bf16.msra.mxu1 %v661_v50  ;;  %v440_v2 = vld [vmem:[#allocation7 + $0x68] sm:$0xff]  ;;  %v441_v4 = vld [vmem:[#allocation7 + $0x70] sm:$0xff]  ;;  %v442_v5 = vld [vmem:[#allocation7 + $0x78] sm:$0xff] }
  0x55   :  { %539 = vmatmul.mubr.msk.f32.vlgmr.msra.gmra.mrb[0].mxu0 %vm87_vm0, %v73_v18  ;;  %666 = vmatprep.subr.bf16.mxu1 %v665_v52  ;;  %v685_v3 = vpack.c.bf16 %v440_v2, %v439_v1  ;;  %v689_v6 = vpack.c.bf16 %v442_v5, %v441_v4 }
  0x56   :  { %164 = vmatprep.mubr.f32.mxu0 %v837_v0  ;;  %648 = vmatpush3.bf16.msra.mxu0 %v645_v15  ;;  %v681_v0 = vpack.c.bf16 %v438_v63, %v437_v62 }
  0x57   :  { %650 = vmatprep.subr.bf16.mxu0 %v649_v19 }
  0x58   :  { %668 = vmatpush3.bf16.msra.mxu1 %v665_v52 }
  0x59   :  { %540 = vmatmul.mubr.msk.f32.gmra.mrb[2].mxu0 %vm87_vm0, %v74_v20  ;;  %670 = vmatprep.subr.bf16.mxu1 %v669_v55 }
  0x5a   :  { %652 = vmatpush3.bf16.msra.mxu0 %v649_v19  ;;  %585 = vmatprep.mubr.msk.f32.mxu0 %vm87_vm0, %v73_v18 }
  0x5c   :  { %672 = vmatpush3.bf16.msra.mxu1 %v669_v55 }
  0x5d   :  { %586 = vmatmul.mubr.msk.f32.vlgmr.msra.gmra.mrb[4].mxu0 %vm87_vm0, %v74_v20  ;;  %674 = vmatprep.subr.bf16.mxu1 %v673_v58 }
  0x60   :  { %676 = vmatpush3.bf16.msra.mxu1 %v673_v58 }
  0x61   :  { %678 = vmatprep.subr.bf16.mxu1 %v677_v61 }
  0x64   :  { %680 = vmatpush3.bf16.msra.mxu1 %v677_v61 }
  0x65   :  { %682 = vmatprep.subr.bf16.mxu1 %v681_v0 }
  0x68   :  { %684 = vmatpush3.bf16.msra.mxu1 %v681_v0 }
  0x69   :  { %686 = vmatprep.subr.bf16.mxu1 %v685_v3 }
  0x6c   :  { %688 = vmatpush3.bf16.msra.mxu1 %v685_v3 }
  0x6d   :  { %690 = vmatprep.subr.bf16.mxu1 %v689_v6 }
  0x70   :  { %692 = vmatpush3.bf16.msra.mxu1 %v689_v6 }
 0x128   :  { %v160_v21 = vpop.f32.mrb[0].mxu0 }
 0x129   :  { %v162_v22 = vpop.f32.mrb[1].mxu0  ;;  %592 = vmatprep.mubr.f32.mxu0 %v160_v21 }
 0x12c   :  { %v166_v23 = vpop.f32.mrb[2].mxu0 }
 0x12d   :  { %v168_v24 = vpop.f32.mrb[3].mxu0 }
 0x12e   :  { %v653_v25 = vpack.c.bf16 %v168_v24, %v162_v22 }
 0x130   :  { %654 = vmatprep.subr.bf16.mxu0 %v653_v25  ;;  %v587_v26 = vpop.f32.mrb[4].mxu0 }
 0x131   :  { %656 = vmatpush3.bf16.xpose.msra.mxu0 %v653_v25  ;;  %v237_v27 = vpop.f32.mrb[5].mxu0 }
 0x132   :  { %v657_v28 = vpack.c.bf16 %v587_v26, %v237_v27 }
 0x134   :  { %658 = vmatprep.subr.bf16.mxu0 %v657_v28 }
 0x138   :  { %593 = vmatmul.mubr.f32.vlgmr.msra.gmra.mrb[6].mxu0 %v166_v23 }
 0x139   :  { %660 = vmatpush3.bf16.msra.mxu0 %v657_v28 }
 0x20b   :  { %v594_v30 = vpop.f32.mrb[6].mxu0 }
 0x20c   :  { %v314_v32 = vpop.f32.mrb[7].mxu0  ;;  %v320_v34 = vadd.f32 %v594_v30, %v247_v31 }
 0x20d   :  { %v315_v33 = vadd.f32 %v314_v32, %v246_v29 }
 0x20e   :  { %v327_v36 = vsel %vm323_vm1, %v320_v34, -inf }
 0x20f   :  { %v324_v35 = vsel %vm323_vm1, %v315_v33, -inf }
 0x210   :  { %325 = vmax.xlane.f32.xlu0 %v324_v35 }
 0x214   :  { %328 = vmax.xlane.f32.xlu0 %v327_v36 }
 0x29d   :  { %v326_v37 = vpop.xlane.xlu0 %325 }
 0x29e   :  { %v330_v38 = vsub.f32 %v315_v33, %v326_v37 }
 0x2a0   :  { %v332_v39 = vmul.f32 1.442695, %v330_v38 }
 0x2a1   :  { %v329_v40 = vpop.xlane.xlu0 %328 }
 0x2a2   :  { %703 = vpow2.f32 %v332_v39  ;;  %v331_v41 = vsub.f32 %v320_v34, %v329_v40 }
 0x2a4   :  { %v334_v42 = vmul.f32 1.442695, %v331_v41 }
 0x2a6   :  { %705 = vpow2.f32 %v334_v42 }
 0x2ac   :  { %v704_v43 = vpop.eup %703 }
 0x2ad   :  { %v336_v44 = vsel %vm323_vm1, %v704_v43, 0.0 }
 0x2ae   :  { %337 = vadd.xlane.f32.xlu1 %v336_v44 }
 0x2b0   :  { %v706_v45 = vpop.eup %705 }
 0x2b1   :  { %v339_v46 = vsel %vm323_vm1, %v706_v45, 0.0 }
 0x2b2   :  { %340 = vadd.xlane.f32.xlu1 %v339_v46 }
 0x33b   :  { %v338_v7 = vpop.xlane.xlu1 %337 }
 0x33c   :  { %707 = vrcp.f32 %v338_v7 }
 0x33f   :  { %v341_v8 = vpop.xlane.xlu1 %340 }
 0x340   :  { %709 = vrcp.f32 %v341_v8 }
 0x346   :  { %v708_v9 = vpop.eup %707 }
 0x347   :  { %v344_v10 = vmul.f32 %v708_v9, %v704_v43 }
 0x349   :  { %599 = vmatprep.mubr.msk.f32.mxu0 %vm323_vm1, %v344_v10 }
 0x34a   :  { %v710_v11 = vpop.eup %709 }
 0x34b   :  { %v345_v12 = vmul.f32 %v710_v11, %v706_v45 }
 0x34d   :  { %600 = vmatmul.mubr.msk.f32.vlgmr.msra.gmra.mrb[8].mxu0 %vm323_vm1, %v345_v12 }
 0x420   :  { %v601_v13 = vpop.f32.mrb[8].mxu0 }
 0x421   :  { %v418_v14 = vpop.f32.mrb[9].mxu0 }
 0x422   :  { %634 = vmatprep.mubr.f32.mxu1 %v418_v14 }
 0x423   :  { %635 = vmatmul.mubr.f32.vlgmr.msra.gmra.mrb[0].mxu1 %v601_v13 }
 0x4f6   :  { %v636_v15 = vpop.f32.mrb[0].mxu1 }
 0x4f7   :  { %519 = vst [vmem:[#allocation10 + $0x8] sm:$0xff] %v636_v15  ;;  %v509_v16 = vpop.f32.mrb[1].mxu1 }
 0x4f8   :  { %518 = vst [vmem:[#allocation10] sm:$0xff] %v509_v16 }
 0x4f9   :  { %810 = shalt.err (!%p807_p8)
}
 0x4fa   :  { %s811_s17 = scalar_lea.hbm %s953_s4, 256 }
 0x4fb   :  { %p812_p9 = scmp.ne.s32.totalorder %s953_s4, %s811_s17  ;;  %p815_p10 = scmp.lt.u32.totalorder %s811_s17, %s953_s4 }
 0x4fd   :  { %p817_p11 = pnand %p815_p10, %p812_p9 }
 0x4ff   :  { %820 = shalt.err (!%p817_p11)
}
 0x500   :  { %531 = dma.vmem_to_hbm [thread:$0]  %s526_s12, 256, %s953_s4, [#allocation4], %s833_s1, %s833_s1, %s834_s13  }
 0x501   :  { %827 = dma.done.wait [#allocation4], 256  }
 0x502   :  { %828 = vsyncadd [#allocation4], 4294967040 }
 0x503   :  { %535 = vsyncpa [#allocation3], 1 }
 0x504   :  { %536 = vsyncpa [#allocation6], 1 }
 0x505   :  { %537 = vsyncpa [#allocation9], 1 }
 0x506   :  { %538 = vsyncpa [#allocation4], 1 }

</bundles_post_ra>
